<compile_context>
chip_gen: v6e
topology: v6e:2x2x1
jax: 0.10.0
libtpu: 0.0.40
codegen_flags: <defaults>
</compile_context>

<pallas_src>
import jax
import jax.numpy as jnp
from jax import lax
from jax.experimental import pallas as pl
from jax.experimental.pallas import tpu as pltpu

_EPS_ADD = 0.01
_LANE = 128
_SUBLANE = 8


def _round_down(x, m):
    return (x // m) * m


def _select_tiling():
    """Pick rows-per-tile and an explicit VMEM limit from chip VMEM capacity."""
    tr_max, vmem_limit = 4096, 40 << 20          # safe for v7x (64 MiB VMEM/TC)
    try:
        cap = pltpu.get_tpu_info().vmem_capacity_bytes
        if cap >= (100 << 20):                    # v5e / v6e: 128 MiB VMEM
            tr_max, vmem_limit = 8192, 64 << 20
    except Exception:
        pass
    return tr_max, vmem_limit


def _make_kernel(tr, valid_full, valid_last, num_par):
    tile_elems = tr * _LANE

    def kernel(p_ref, y_ref, out_ref):
        # p_ref, y_ref: (1, tr, 128) tiles in native dtype.
        # out_ref: (1, 8, 128) f32 accumulator, resident across the i axis.
        p = pl.program_id(0)
        i = pl.program_id(1)

        @pl.when(i == 0)
        def _():
            out_ref[...] = jnp.zeros_like(out_ref)

        a = p_ref[0].astype(jnp.float32) + _EPS_ADD
        b = y_ref[0].astype(jnp.float32) + _EPS_ADD
        hi = jnp.maximum(a, b)
        lo = jnp.minimum(a, b)
        r = hi / lo                      # single exact f32 divide per element

        def fold(x):                     # (tr,128) -> (8,128): VPU adds only
            return jnp.sum(x.reshape(-1, _SUBLANE, _LANE), axis=0)

        # Valid elements remaining for this core at the start of this tile.
        valid_p = jnp.where(p == num_par - 1,
                            jnp.int32(valid_last), jnp.int32(valid_full))
        remaining = valid_p - i * tile_elems
        tile_full = remaining >= tile_elems

        @pl.when(tile_full)
        def _():
            out_ref[...] = out_ref[...] + fold(r)[None, :, :]

        @pl.when(jnp.logical_not(tile_full))
        def _():
            # Boundary tile only: mask padded / out-of-range elements to 0.
            row = lax.broadcasted_iota(jnp.int32, (tr, _LANE), 0)
            lane = lax.broadcasted_iota(jnp.int32, (tr, _LANE), 1)
            local = row * _LANE + lane
            rm = jnp.where(local < remaining, r, 0.0)
            out_ref[...] = out_ref[...] + fold(rm)[None, :, :]

    return kernel


def mean_ratio(pred, y):
    """Pallas implementation of MeanRatio.forward. Returns scalar float32."""
    assert pred.shape == y.shape, (pred.shape, y.shape)
    n = int(pred.size)

    p_flat = pred.reshape(-1)
    y_flat = y.reshape(-1)

    rows = max(-(-n // _LANE), _SUBLANE)         # >= 8 rows of 128 lanes
    padded_n = rows * _LANE
    if padded_n != n:
        # Only when numel is not a multiple of 128 (or < 1024).  The pad costs
        # one copy, but the in-kernel mask makes it semantically inert.
        # TODO(synk): a manual-DMA (memory_space=pl.ANY) path could avoid even
        # this copy for misaligned tails; not worth it for <1 KiB of padding.
        p_flat = jnp.pad(p_flat, (0, padded_n - n))
        y_flat = jnp.pad(y_flat, (0, padded_n - n))

    # Megacore split (v7x): costs nothing here (no padding needed); on
    # single-TC v5e/v6e it is just a serial loop split.
    num_par = 2 if (rows % 2 == 0 and rows >= 2 * _SUBLANE) else 1
    rows_per_core = rows // num_par

    tr_max, vmem_limit = _select_tiling()
    tr = min(tr_max, _round_down(rows_per_core, _SUBLANE))
    steps = -(-rows_per_core // tr)

    valid_full = rows_per_core * _LANE
    valid_last = n - (num_par - 1) * valid_full

    p3 = p_flat.reshape(num_par, rows_per_core, _LANE)
    y3 = y_flat.reshape(num_par, rows_per_core, _LANE)

    cost = pl.CostEstimate(
        flops=7 * n,
        transcendentals=n,
        bytes_accessed=n * (pred.dtype.itemsize + y.dtype.itemsize)
        + num_par * _SUBLANE * _LANE * 4,
    )

    counts = pl.pallas_call(
        _make_kernel(tr, valid_full, valid_last, num_par),
        out_shape=jax.ShapeDtypeStruct((num_par, _SUBLANE, _LANE), jnp.float32),
        grid_spec=pltpu.PrefetchScalarGridSpec(
            num_scalar_prefetch=0,
            grid=(num_par, steps),
            in_specs=[
                pl.BlockSpec((1, tr, _LANE), lambda p, i: (p, i, 0)),
                pl.BlockSpec((1, tr, _LANE), lambda p, i: (p, i, 0)),
            ],
            out_specs=pl.BlockSpec((1, _SUBLANE, _LANE), lambda p, i: (p, 0, 0)),
        ),
        compiler_params=pltpu.CompilerParams(
            dimension_semantics=("parallel", "arbitrary"),
            vmem_limit_bytes=vmem_limit,
        ),
        cost_estimate=cost,
    )(p3, y3)

    return jnp.sum(counts) / jnp.float32(n)


def _reference_mean_ratio(pred, y):
    r = (pred.astype(jnp.float32) + _EPS_ADD) / (y.astype(jnp.float32) + _EPS_ADD)
    r = jnp.where(r < 1.0, 1.0 / r, r)
    return jnp.mean(r)


if __name__ == "__main__":
    key = jax.random.PRNGKey(0)
    kp, ky = jax.random.split(key)

    # Aligned case: (B, C, H, W) voxel grids (free reshape, no pad, 2-core split).
    B, C, H, W = 2, 4, 16, 16
    pred = jax.random.uniform(kp, (B, C, H, W), dtype=jnp.float32)
    y = jax.random.uniform(ky, (B, C, H, W), dtype=jnp.float32)
    out = mean_ratio(pred, y)
    jax.block_until_ready(out)
    ref = _reference_mean_ratio(pred, y)
    assert jnp.allclose(out, ref, rtol=1e-4, atol=1e-5), (out, ref)

    # Ragged case: exercises the in-kernel boundary mask (no full-array pad path).
    pred2 = jax.random.uniform(kp, (3, 5, 7), dtype=jnp.float32)
    y2 = jax.random.uniform(ky, (3, 5, 7), dtype=jnp.float32)
    out2 = mean_ratio(pred2, y2)
    jax.block_until_ready(out2)
    ref2 = _reference_mean_ratio(pred2, y2)
    assert jnp.allclose(out2, ref2, rtol=1e-4, atol=1e-5), (out2, ref2)

    print("KERNEL_OK")
</pallas_src>

<mosaic_0001>
module attributes {stable_mosaic.version = 11 : i64} {
  func.func @kernel(%arg0: i32, %arg1: i32, %arg2: memref<1x8x128xf32, #tpu.memory_space<vmem>>, %arg3: memref<1x8x128xf32, #tpu.memory_space<vmem>>, %arg4: memref<1x8x128xf32, #tpu.memory_space<vmem>>) attributes {dimension_semantics = [#tpu.dimension_semantics<parallel>, #tpu.dimension_semantics<arbitrary>], iteration_bounds = array<i64: 2, 1>, scalar_prefetch = 0 : i64, scratch_operands = 0 : i64, tpu.core_type = #tpu.core_type<tc>, window_params = [{transform_indices = @transform_0, window_bounds = array<i64: 1, 8, 128>}, {transform_indices = @transform_1, window_bounds = array<i64: 1, 8, 128>}, {transform_indices = @transform_2, window_bounds = array<i64: 1, 8, 128>}]} {
    %c0_i32 = arith.constant 0 : i32
    %0 = arith.cmpi eq, %arg1, %c0_i32 : i32
    %1 = arith.extui %0 : i1 to i32
    %c0_i32_0 = arith.constant 0 : i32
    %2 = arith.cmpi ne, %1, %c0_i32_0 : i32
    scf.if %2 {
      %cst_12 = arith.constant 0.000000e+00 : f32
      %24 = vector.broadcast %cst_12 : f32 to vector<1x8x128xf32>
      %c0_13 = arith.constant 0 : index
      %c0_14 = arith.constant 0 : index
      %c0_15 = arith.constant 0 : index
      %25 = vector.load %arg4[%c0_13, %c0_14, %c0_15] : memref<1x8x128xf32, #tpu.memory_space<vmem>>, vector<1x8x128xf32>
      tpu.vector_store %arg4[%c0_13, %c0_14, %c0_15], %24 {strides = array<i32>} : memref<1x8x128xf32, #tpu.memory_space<vmem>>, vector<1x8x128xf32>,
    } else {
    }
    %c0 = arith.constant 0 : index
    %c0_1 = arith.constant 0 : index
    %c0_2 = arith.constant 0 : index
    %3 = vector.load %arg2[%c0, %c0_1, %c0_2] : memref<1x8x128xf32, #tpu.memory_space<vmem>>, vector<1x8x128xf32>
    %4 = vector.shape_cast %3 : vector<1x8x128xf32> to vector<8x128xf32>
    %cst = arith.constant 0.00999999977 : f32
    %5 = vector.broadcast %cst : f32 to vector<8x128xf32>
    %6 = arith.addf %4, %5 : vector<8x128xf32>
    %c0_3 = arith.constant 0 : index
    %c0_4 = arith.constant 0 : index
    %c0_5 = arith.constant 0 : index
    %7 = vector.load %arg3[%c0_3, %c0_4, %c0_5] : memref<1x8x128xf32, #tpu.memory_space<vmem>>, vector<1x8x128xf32>
    %8 = vector.shape_cast %7 : vector<1x8x128xf32> to vector<8x128xf32>
    %cst_6 = arith.constant 0.00999999977 : f32
    %9 = vector.broadcast %cst_6 : f32 to vector<8x128xf32>
    %10 = arith.addf %8, %9 : vector<8x128xf32>
    %11 = arith.maximumf %6, %10 : vector<8x128xf32>
    %12 = arith.minimumf %6, %10 : vector<8x128xf32>
    %13 = arith.divf %11, %12 : vector<8x128xf32>
    %c1_i32 = arith.constant 1 : i32
    %14 = arith.cmpi eq, %arg0, %c1_i32 : i32
    %c1024_i32 = arith.constant 1024 : i32
    %c1024_i32_7 = arith.constant 1024 : i32
    %15 = arith.select %14, %c1024_i32, %c1024_i32_7 : i32
    %c1024_i32_8 = arith.constant 1024 : i32
    %16 = arith.muli %arg1, %c1024_i32_8 : i32
    %17 = arith.subi %15, %16 : i32
    %c1024_i32_9 = arith.constant 1024 : i32
    %18 = arith.cmpi sge, %17, %c1024_i32_9 : i32
    %19 = arith.extui %18 : i1 to i32
    %c0_i32_10 = arith.constant 0 : i32
    %20 = arith.cmpi ne, %19, %c0_i32_10 : i32
    scf.if %20 {
      %c0_12 = arith.constant 0 : index
      %c0_13 = arith.constant 0 : index
      %c0_14 = arith.constant 0 : index
      %24 = vector.load %arg4[%c0_12, %c0_13, %c0_14] : memref<1x8x128xf32, #tpu.memory_space<vmem>>, vector<1x8x128xf32>
      %25 = vector.shape_cast %13 : vector<8x128xf32> to vector<1x8x128xf32>
      %cst_15 = arith.constant dense<0.000000e+00> : vector<8x128xf32>
      %26 = vector.multi_reduction <add>, %25, %cst_15 [0] : vector<1x8x128xf32> to vector<8x128xf32>
      %27 = vector.shape_cast %26 : vector<8x128xf32> to vector<1x8x128xf32>
      %28 = arith.addf %24, %27 : vector<1x8x128xf32>
      %c0_16 = arith.constant 0 : index
      %c0_17 = arith.constant 0 : index
      %c0_18 = arith.constant 0 : index
      %29 = vector.load %arg4[%c0_16, %c0_17, %c0_18] : memref<1x8x128xf32, #tpu.memory_space<vmem>>, vector<1x8x128xf32>
      tpu.vector_store %arg4[%c0_16, %c0_17, %c0_18], %28 {strides = array<i32>} : memref<1x8x128xf32, #tpu.memory_space<vmem>>, vector<1x8x128xf32>,
    } else {
    }
    %true = arith.constant true
    %21 = arith.xori %18, %true : i1
    %22 = arith.extui %21 : i1 to i32
    %c0_i32_11 = arith.constant 0 : i32
    %23 = arith.cmpi ne, %22, %c0_i32_11 : i32
    scf.if %23 {
      %24 = tpu.iota {dimensions = array<i32: 0>} : vector<8x128xi32>
      %25 = tpu.iota {dimensions = array<i32: 1>} : vector<8x128xi32>
      %c128_i32 = arith.constant 128 : i32
      %26 = vector.broadcast %c128_i32 : i32 to vector<8x128xi32>
      %27 = arith.muli %24, %26 : vector<8x128xi32>
      %28 = arith.addi %27, %25 : vector<8x128xi32>
      %29 = vector.broadcast %17 : i32 to vector<8x128xi32>
      %30 = arith.cmpi slt, %28, %29 : vector<8x128xi32>
      %cst_12 = arith.constant 0.000000e+00 : f32
      %31 = vector.broadcast %cst_12 : f32 to vector<8x128xf32>
      %32 = arith.select %30, %13, %31 : vector<8x128xi1>, vector<8x128xf32>
      %c0_13 = arith.constant 0 : index
      %c0_14 = arith.constant 0 : index
      %c0_15 = arith.constant 0 : index
      %33 = vector.load %arg4[%c0_13, %c0_14, %c0_15] : memref<1x8x128xf32, #tpu.memory_space<vmem>>, vector<1x8x128xf32>
      %34 = vector.shape_cast %32 : vector<8x128xf32> to vector<1x8x128xf32>
      %cst_16 = arith.constant dense<0.000000e+00> : vector<8x128xf32>
      %35 = vector.multi_reduction <add>, %34, %cst_16 [0] : vector<1x8x128xf32> to vector<8x128xf32>
      %36 = vector.shape_cast %35 : vector<8x128xf32> to vector<1x8x128xf32>
      %37 = arith.addf %33, %36 : vector<1x8x128xf32>
      %c0_17 = arith.constant 0 : index
      %c0_18 = arith.constant 0 : index
      %c0_19 = arith.constant 0 : index
      %38 = vector.load %arg4[%c0_17, %c0_18, %c0_19] : memref<1x8x128xf32, #tpu.memory_space<vmem>>, vector<1x8x128xf32>
      tpu.vector_store %arg4[%c0_17, %c0_18, %c0_19], %37 {strides = array<i32>} : memref<1x8x128xf32, #tpu.memory_space<vmem>>, vector<1x8x128xf32>,
    } else {
    }
    return
  }
  func.func @transform_0(%arg0: i32, %arg1: i32) -> (i32, i32, i32) {
    %c0_i32 = arith.constant 0 : i32
    %c0_i32_0 = arith.constant 0 : i32
    return %arg0, %arg1, %c0_i32 : i32, i32, i32
  }
  func.func @transform_1(%arg0: i32, %arg1: i32) -> (i32, i32, i32) {
    %c0_i32 = arith.constant 0 : i32
    %c0_i32_0 = arith.constant 0 : i32
    return %arg0, %arg1, %c0_i32 : i32, i32, i32
  }
  func.func @transform_2(%arg0: i32, %arg1: i32) -> (i32, i32, i32) {
    %c0_i32 = arith.constant 0 : i32
    %c0_i32_0 = arith.constant 0 : i32
    %c0_i32_1 = arith.constant 0 : i32
    return %arg0, %c0_i32, %c0_i32_0 : i32, i32, i32
  }
}

</mosaic_0001>

<bundles_post_ra>
// kernel: tpu_custom_call.1
= control target key start
LH: loop header
LB: loop body
LE: loop exit
PB: predicated region body
PF: predicated region fallthrough
CT: control target
= control target key end

     0   :  { %7 = vsyncpa [#allocation3], 0  ;;  %s778_s0 = inlined_call_operand.hbm [shape: f32[2,8,128], index: 0, kind: input, shape index: {}]   ;;  %s779_s1 = inlined_call_operand.hbm [shape: f32[2,8,128], index: 1, kind: input, shape index: {}]   ;;  %s780_s2 = inlined_call_operand.hbm [shape: f32[2,8,128], index: 2, kind: output, shape index: {}]  }
   0x1   :  { %9 = vsyncpa [#allocation3 + $0x1], 0 }
   0x2   :  { %10 = vsyncpa [#allocation6], 0 }
   0x3   :  { %12 = vsyncpa [#allocation6 + $0x1], 0 }
   0x4   :  { %13 = vsyncpa [#allocation4], 0 }
   0x5   :  { %15 = vsyncpa [#allocation4 + $0x1], 0  ;;  %s617_s9 = smov 0   ;;  %s619_s10 = smov 0  }
   0x6   :  { %s621_s11 = smov 0   ;;  %s623_s12 = smov 0  }
   0x7   :  { %s625_s13 = smov 0   ;;  %s627_s14 = smov 0  }
   0x8 LB: > { %s371_s15 = sadd.s32 4294967295, %s597_s14   ;;  %s372_s16 = sadd.s32 4294967294, %s597_s14   ;;  %s597_s14 = sphi %s627_s14, %s21_s14   ;;  %s593_s13 = sphi %s625_s13, %s792_s13   ;;  %s589_s12 = sphi %s623_s12, %s791_s12   ;;  %s585_s11 = sphi %s621_s11, %s790_s11   ;;  %s581_s10 = sphi %s619_s10, %s789_s10   ;;  %s577_s9 = sphi %s617_s9, %s788_s9  }
   0x9   : > { %s33_s17 = sadd.s32 1, %s593_s13  ;;  %s42_s18 = sadd.s32 1, %s585_s11 }
   0xa   : > { %p35_p0 = scmp.ge.s32.totalorder %s33_s17, 2  ;;  %p49_p1 = scmp.ne.s32.totalorder %s585_s11, %s581_s10 }
   0xb   : > { %p50_p2 = scmp.eq.s32.totalorder %s597_s14, 0  ;;  %p55_p3 = scmp.ne.s32.totalorder %s581_s10, %s577_s9 }
   0xc   : > { %s794_s17 = smov (%p35_p0, %s33_s17), 0  ;;  %p56_p5 = scmp.eq.s32.totalorder %s371_s15, 0 }
   0xd   : > { %p658_p4 = por %p50_p2, %p49_p1  ;;  %s37_s20 = ssub.s32 %s593_s13, %s794_s17 }
   0xe   : > { %p107_p6 = scmp.eq.s32.totalorder %s371_s15, 1  ;;  %p40_p7 = scmp.eq.s32.totalorder %s37_s20, 0 }
   0xf   : > { %p664_p8 = por %p56_p5, %p55_p3  ;;  %p113_p10 = scmp.eq.s32.totalorder %s372_s16, 1 }
  0x10   : > { %p668_p9 = por %p107_p6, %p49_p1  ;;  %p404_p13 = scmp.lt.s32.totalorder %s597_s14, 2 }
  0x11   : > { %s673_s23 = scalar_select %p40_p7, %s585_s11, %s42_s18  }
  0x12   : > { %p675_p11 = por %p113_p10, %p55_p3  ;;  %s682_s25 = sand.u32 1, %s585_s11  }
  0x13   : > { %s375_s26 = sshll.u32 %s682_s25, 3  ;;  %s376_s27 = sshll.u32 %s593_s13, 7 }
  0x14   : > { %s143_s30 = scalar_lea.hbm %s778_s0, %s376_s27  ;;  %s137_s3 = scalar_lea.vmem [#allocation2], %s375_s26 }
  0x15   : > { %s145_s4 = sshll.u32 %s137_s3, 4  ;;  %p691_p0 = pnand %p404_p13, %p658_p4  ;;  %s146_s4 = int_to_ptr.vmem [resolvable:$true] %s145_s4 }
  0x16   : > { %p379_p1 = scmp.ge.s32.totalorder %s597_s14, 1  ;;  %p169_p2 = scmp.lt.s32.totalorder %s597_s14, 3 }
  0x17   : > { %s134_s6 = scalar_lea.sflag [#allocation3], %s682_s25  ;;  %p459_p3 = pneg %p691_p0 }
  0x18   : > { %s470_s7 = scalar_lea.vmem %s146_s4, 128  ;;  %s599_s8 = smov [#allocation2]  }
  0x19   : > { %p471_p5 = scmp.ne.s32.totalorder %s146_s4, %s470_s7  ;;  %s475_s15 = sshll.u32 %s599_s8, 4  ;;  %s476_s15 = int_to_ptr.vmem [resolvable:$false] %s475_s15 }
  0x1a   : > { %s477_s16 = scalar_lea.vmem %s476_s15, 256  ;;  %p478_p4 = scmp.lt.s32.totalorder %s146_s4, %s476_s15 }
  0x1b   : > { %p473_p6 = pnand %p471_p5, %p459_p3  ;;  %p479_p10 = scmp.lt.s32.totalorder %s477_s16, %s470_s7 }
  0x1d   : > { %p474_p7 = pneg %p473_p6  ;;  %p480_p13 = por %p479_p10, %p478_p4 }
  0x1f   : > { %p481_p12 = pnand %p480_p13, %p474_p7 }
  0x21   : > { %484 = shalt.err (!%p481_p12)
}
  0x22   : > { %396 = dma.hbm_to_vmem [thread:$0]  (!%p691_p0), %s143_s30, 128, %s146_s4, %s134_s6  }
  0x23   : > { %p709_p5 = pnand %p379_p1, %p169_p2  ;;  %s162_s28 = scalar_lea.hbm %s779_s1, %s376_s27 }
  0x24   : > { %s156_s29 = scalar_lea.vmem [#allocation5], %s375_s26  ;;  %s153_s7 = scalar_lea.sflag [#allocation6], %s682_s25 }
  0x25   : > { %s164_s3 = sshll.u32 %s156_s29, 4  ;;  %s600_s30 = smov [#allocation5]   ;;  %s165_s3 = int_to_ptr.vmem [resolvable:$true] %s164_s3 }
  0x26   : > { %s498_s8 = scalar_lea.vmem %s165_s3, 128  ;;  %s503_s4 = sshll.u32 %s600_s30, 4  ;;  %s504_s4 = int_to_ptr.vmem [resolvable:$false] %s503_s4 }
  0x27   : > { %p499_p12 = scmp.ne.s32.totalorder %s165_s3, %s498_s8  ;;  %s505_s6 = scalar_lea.vmem %s504_s4, 256 }
  0x28   : > { %p506_p1 = scmp.lt.s32.totalorder %s165_s3, %s504_s4  ;;  %p507_p2 = scmp.lt.s32.totalorder %s505_s6, %s498_s8 }
  0x29   : > { %p501_p6 = pnand %p499_p12, %p459_p3 }
  0x2a   : > { %p508_p4 = por %p507_p2, %p506_p1 }
  0x2b   : > { %p502_p7 = pneg %p501_p6 }
  0x2d   : > { %p509_p10 = pnand %p508_p4, %p502_p7 }
  0x2f   : > { %512 = shalt.err (!%p509_p10)
}
  0x30   : > { %399 = dma.hbm_to_vmem [thread:$0]  (!%p691_p0), %s162_s28, 128, %s165_s3, %s153_s7  }
  0x31   : > { %173 = sbr.rel (%p709_p5) target bundleno = 91 (0x5b), region = 28  ;;  %s725_s25 = sand.u32 (!%p709_p5), 1, %s581_s10  }
  0x32   : > { %s380_s26 = sshll.u32 (!%p709_p5), %s725_s25, 3  ;;  %s176_s27 = scalar_lea.sflag (!%p709_p5), [#allocation3], %s725_s25 }
  0x33   : > { %s179_s15 = scalar_lea.vmem (!%p709_p5), [#allocation2], %s380_s26 }
  0x36   : > { %564 = dma.done.wait (%p664_p8), %s176_s27, 128  }
  0x37   : > { %566 = vsyncadd (%p664_p8), %s176_s27, 4294967168  ;;  %s185_s5 = scalar_lea.sflag [#allocation6], %s725_s25  ;;  %s188_s16 = scalar_lea.vmem [#allocation5], %s380_s26 }
  0x38   : > { %568 = dma.done.wait (%p664_p8), %s185_s5, 128  }
  0x39   : > { %570 = vsyncadd (%p664_p8), %s185_s5, 4294967168  ;;  %v219_v0 = vld [vmem:[%s179_s15] sm:$0xff]  ;;  %v221_v1 = vld [vmem:[%s188_s16] sm:$0xff]  ;;  %s384_s18 = sshll.u32 %s589_s12, 7  ;;  %s213_s19 = scalar_lea.vmem [#allocation7], %s380_s26 }
  0x3a   : > { %v220_v2 = vadd.f32 0.01, %v219_v0  ;;  %v222_v3 = vadd.f32 0.01, %v221_v1  ;;  %s268_s20 = sshll.u32 %s213_s19, 4  ;;  %s266_s21 = scalar_lea.hbm %s780_s2, %s384_s18  ;;  %s269_s20 = int_to_ptr.vmem [resolvable:$true] %s268_s20 }
  0x3b   : > { %s255_s3 = scalar_lea.sflag [#allocation4], %s725_s25  ;;  %s513_s7 = scalar_lea.vmem %s269_s20, 128 }
  0x3c   : > { %v224_v4 = vmin.f32 %v220_v2, %v222_v3  ;;  %v223_v5 = vmax.f32 %v220_v2, %v222_v3  ;;  %p514_p8 = scmp.ne.s32.totalorder %s269_s20, %s513_s7  ;;  %s601_s8 = smov [#allocation7]  }
  0x3d   : > { %s517_s30 = sshll.u32 %s601_s8, 4  ;;  %s518_s30 = int_to_ptr.vmem [resolvable:$false] %s517_s30 }
  0x3e   : > { %455 = vrcp.f32 %v224_v4  ;;  %p515_p0 = pnand %p514_p8, %p668_p9  ;;  %s519_s4 = scalar_lea.vmem %s518_s30, 256 }
  0x3f   : > { %p520_p13 = scmp.lt.s32.totalorder %s269_s20, %s518_s30  ;;  %p521_p5 = scmp.lt.s32.totalorder %s519_s4, %s513_s7 }
  0x40   : > { %p516_p3 = pneg %p515_p0 }
  0x41   : > { %p522_p12 = por %p521_p5, %p520_p13 }
  0x43   : > { %p523_p6 = pnand %p522_p12, %p516_p3 }
  0x4b   : > { %v456_v6 = vpop.eup %455 }
  0x4c   : > { %v226_v7 = vmul.f32 %v456_v6, %v223_v5 }
  0x4e   : > { %236 = vst [vmem:[%s213_s19] sm:$0xff] %v226_v7 }
  0x4f   : > { %526 = shalt.err (!%p523_p6)
}
  0x50   : > { %s527_s12 = scalar_lea.hbm %s266_s21, 128  ;;  %s531_s26 = scalar_lea.hbm %s780_s2, 256 }
  0x51   : > { %p528_p7 = scmp.ne.s32.totalorder %s266_s21, %s527_s12  ;;  %p532_p4 = scmp.lt.s32.totalorder %s266_s21, %s780_s2 }
  0x52   : > { %p533_p10 = scmp.lt.s32.totalorder %s531_s26, %s527_s12 }
  0x53   : > { %p529_p1 = pnand %p528_p7, %p668_p9 }
  0x54   : > { %p534_p8 = por %p533_p10, %p532_p4 }
  0x55   : > { %p530_p2 = pneg %p529_p1 }
  0x57   : > { %p535_p0 = pnand %p534_p8, %p530_p2 }
  0x59   : > { %538 = shalt.err (!%p535_p0)
}
  0x5a   : > { %391 = dma.vmem_to_hbm [thread:$0]  (%p668_p9), %s269_s20, 128, %s266_s21, %s255_s3  }
  0x5b PF: > { %s280_s5 = sand.u32 1, %s577_s9   ;;  %p787_p3 = scmp.ge.s32.totalorder %s597_s14, 2 }
  0x5c   : > { %s281_s16 = scalar_lea.sflag [#allocation4], %s280_s5 }
  0x5d   : > { %p401_p13 = pnand %p787_p3, %p675_p11 }
  0x5f   : > { %p402_p5 = pneg %p401_p13 }
  0x61   : > { %572 = dma.done.wait (%p402_p5), %s281_s16, 128  }
  0x62   : > { %574 = vsyncadd (%p402_p5), %s281_s16, 4294967168  ;;  %s21_s14 = sadd.s32 1, %s597_s14   ;;  %s788_s9 = smov %s581_s10 }
  0x63   : > { %p18_p12 = scmp.ge.s32.totalorder %s21_s14, 4   ;;  %s789_s10 = smov %s585_s11 }
  0x64   : > { %s790_s11 = smov %s673_s23  ;;  %s791_s12 = smov %s593_s13 }
  0x65   : > { %s792_s13 = smov %s794_s17  ;;  %20 = sbr.rel (!%p18_p12) target bundleno = 8 (0x8), region = 98 }
  0x6a   :  { %286 = vsyncpa [#allocation3], 1 }
  0x6b   :  { %288 = vsyncpa [#allocation3 + $0x1], 1 }
  0x6c   :  { %289 = vsyncpa [#allocation6], 1 }
  0x6d   :  { %291 = vsyncpa [#allocation6 + $0x1], 1 }
  0x6e   :  { %292 = vsyncpa [#allocation4], 1 }
  0x6f   :  { %294 = vsyncpa [#allocation4 + $0x1], 1 }

</bundles_post_ra>
